<compile_context>
chip_gen: v5e
topology: v5e:2x2
jax: 0.10.0
libtpu: 0.0.40
codegen_flags: <defaults>
</compile_context>

<pallas_src>
import functools

import jax
import jax.numpy as jnp
from jax.experimental import pallas as pl
from jax.experimental.pallas import tpu as pltpu


def _round_up(x, m):
    return ((x + m - 1) // m) * m


def _cdiv(a, b):
    return (a + b - 1) // b


def _mlp_kernel(n_branches, *refs):
    """Fused 3-layer MLP applied to n_branches input tiles that share one set of
    weights already resident in VMEM.  bf16 MXU operands, f32 accumulate/bias/ReLU."""
    x_refs = refs[:n_branches]
    w1_ref, b1_ref, w2_ref, b2_ref, w3_ref, b3_ref = refs[n_branches:n_branches + 6]
    o_refs = refs[n_branches + 6:]
    bb = x_refs[0].shape[0]

    # Stack branches along M (VMEM) so one MXU dot chain serves all of them; cast to
    # bf16 in-kernel (VPU, hidden under the MXU) instead of a wrapper-side HBM pass.
    if n_branches > 1:
        x = jnp.concatenate([r[...] for r in x_refs], axis=0)
    else:
        x = x_refs[0][...]
    x = x.astype(jnp.bfloat16)

    h1 = jnp.dot(x, w1_ref[...], preferred_element_type=jnp.float32) + b1_ref[...]
    h1 = jnp.maximum(h1, 0.0).astype(jnp.bfloat16)
    h2 = jnp.dot(h1, w2_ref[...], preferred_element_type=jnp.float32) + b2_ref[...]
    h2 = jnp.maximum(h2, 0.0).astype(jnp.bfloat16)
    out = jnp.dot(h2, w3_ref[...], preferred_element_type=jnp.float32) + b3_ref[...]

    for i, o_ref in enumerate(o_refs):
        o_ref[...] = out[i * bb:(i + 1) * bb].astype(o_ref.dtype)


def prepare_params(params):
    """One-time packing of the shared embedding-net weights for the kernel.

    Done once at parameter-creation time (NOT per forward call): bf16 MXU operands,
    f32 biases shaped (1, n), and W3/b3 zero-padded so the kernel output is
    lane-dense (multiple of 128).  Returns (w1,b1,w2,b2,w3,b3,d_out)."""
    w1, b1, w2, b2, w3, b3 = params
    d_out = w3.shape[1]
    d_out_pad = max(128, _round_up(d_out, 128))
    if d_out_pad != d_out:
        w3 = jnp.pad(w3, ((0, 0), (0, d_out_pad - d_out)))
        b3 = jnp.pad(b3.reshape(1, -1), ((0, 0), (0, d_out_pad - d_out)))
    return (
        w1.astype(jnp.bfloat16),
        b1.reshape(1, -1).astype(jnp.float32),
        w2.astype(jnp.bfloat16),
        b2.reshape(1, -1).astype(jnp.float32),
        w3.astype(jnp.bfloat16),
        b3.reshape(1, -1).astype(jnp.float32),
        d_out,
    )


def _embedding_pallas_multi(xs, prepared, *, max_block_b=512):
    """Shared embedding net applied to each (B, D_in) array in `xs` with one fused
    pallas_call (weights DMA'd to VMEM once).  Returns a tuple of (B, D_out) arrays."""
    w1, b1, w2, b2, w3, b3, d_out = prepared
    n = len(xs)
    B, d_in = xs[0].shape
    hidden = w1.shape[1]
    d_out_pad = w3.shape[1]

    # Large flattened inputs: shrink the batch tile so double-buffered x tiles plus
    # resident weights stay inside v7x's 64 MiB VMEM.
    if d_in >= 8192:
        max_block_b = min(max_block_b, 256)

    # ---- batch tiling: pad B to 16 (bf16 sublane packing), split the grid evenly so
    # padding waste is <= one 16-row group per step, and use >= 2 steps when B allows
    # so the "parallel" axis can shard across v7x's 2 TensorCores.
    B16 = _round_up(B, 16)
    n_steps = max(_cdiv(B16, max_block_b), 2 if B16 >= 32 else 1)
    block_b = _round_up(_cdiv(B16, n_steps), 16)
    B_pad = block_b * n_steps
    if B_pad != B:
        xs = tuple(jnp.pad(x, ((0, B_pad - B), (0, 0))) for x in xs)
    grid = (n_steps,)

    # ---- BlockSpecs: x / out tiled over batch (double-buffered); weights & biases
    # are grid-invariant and single-buffered to halve their VMEM footprint.
    x_spec = pl.BlockSpec((block_b, d_in), lambda i: (i, 0))
    out_spec = pl.BlockSpec((block_b, d_out_pad), lambda i: (i, 0))

    def w_spec(shape):
        return pl.BlockSpec(shape, lambda i: (0, 0), pipeline_mode=pl.Buffered(1))

    # ---- explicit VMEM budget (default scoped VMEM: 16 MiB v5e / 32 MiB v6e,v7x).
    bytes_x_tiles = n * block_b * d_in * 4 * 2            # f32 inputs, double-buffered
    bytes_out_tiles = n * block_b * d_out_pad * 4 * 2     # f32 outputs, double-buffered
    bytes_weights = (d_in * hidden + hidden * hidden + hidden * d_out_pad) * 2  # bf16
    bytes_bias = (2 * hidden + d_out_pad) * 4
    bytes_live = n * block_b * (d_in * 2 + 2 * hidden * 4 + d_out_pad * 4)  # intermediates
    vmem_est = bytes_x_tiles + bytes_out_tiles + bytes_weights + bytes_bias + bytes_live
    vmem_limit = int(min(max(2 * vmem_est, 32 << 20), 64 << 20))

    flops = 2 * n * B_pad * (d_in * hidden + hidden * hidden + hidden * d_out_pad)
    bytes_accessed = (
        n * B_pad * d_in * 4
        + bytes_weights + bytes_bias
        + n * B_pad * d_out_pad * 4)

    outs = pl.pallas_call(
        functools.partial(_mlp_kernel, n),
        out_shape=tuple(
            jax.ShapeDtypeStruct((B_pad, d_out_pad), jnp.float32) for _ in range(n)),
        grid_spec=pltpu.PrefetchScalarGridSpec(
            num_scalar_prefetch=0,
            grid=grid,
            in_specs=[x_spec] * n + [
                w_spec((d_in, hidden)),       # W1
                w_spec((1, hidden)),          # b1
                w_spec((hidden, hidden)),     # W2
                w_spec((1, hidden)),          # b2
                w_spec((hidden, d_out_pad)),  # W3 (lane-dense padded)
                w_spec((1, d_out_pad)),       # b3 (lane-dense padded)
            ],
            out_specs=tuple(out_spec for _ in range(n)),
        ),
        compiler_params=pltpu.CompilerParams(
            dimension_semantics=("parallel",),
            vmem_limit_bytes=vmem_limit),
        cost_estimate=pl.CostEstimate(
            flops=flops, transcendentals=0, bytes_accessed=bytes_accessed),
    )(*xs, w1, b1, w2, b2, w3, b3)

    return tuple(o[:B, :d_out] for o in outs)


def double_net_forward(x1, x2, prepared):
    """DoubleNet.forward: shared embedding applied to x1 and x2 in one pallas_call."""
    B = x1.shape[0]
    o1, o2 = _embedding_pallas_multi(
        (x1.reshape(B, -1), x2.reshape(B, -1)), prepared)
    return o1, o2


def get_embedding(x, prepared):
    """DoubleNet.get_embedding equivalent."""
    (o,) = _embedding_pallas_multi((x.reshape(x.shape[0], -1),), prepared)
    return o


def init_params(key, d_in, hidden, d_out):
    """Deterministic torch.nn.Linear-like init; W stored as (in, out)."""
    ks = jax.random.split(key, 6)

    def linear(kw, kb, fan_in, fan_out):
        bound = 1.0 / jnp.sqrt(fan_in)
        w = jax.random.uniform(kw, (fan_in, fan_out), jnp.float32, -bound, bound)
        b = jax.random.uniform(kb, (1, fan_out), jnp.float32, -bound, bound)
        return w, b

    w1, b1 = linear(ks[0], ks[1], d_in, hidden)
    w2, b2 = linear(ks[2], ks[3], hidden, hidden)
    w3, b3 = linear(ks[4], ks[5], hidden, d_out)
    return (w1, b1, w2, b2, w3, b3)


def _reference_bf16(x, params):
    # Mirrors the kernel's bf16-operand / f32-accumulate numerics in pure JAX.
    w1, b1, w2, b2, w3, b3 = params
    bf = jnp.bfloat16
    h1 = jnp.maximum(
        jnp.dot(x.astype(bf), w1.astype(bf), preferred_element_type=jnp.float32) + b1, 0.0)
    h2 = jnp.maximum(
        jnp.dot(h1.astype(bf), w2.astype(bf), preferred_element_type=jnp.float32) + b2, 0.0)
    return jnp.dot(h2.astype(bf), w3.astype(bf), preferred_element_type=jnp.float32) + b3


def _reference_f32(x, params):
    w1, b1, w2, b2, w3, b3 = params
    h1 = jnp.maximum(x @ w1 + b1, 0.0)
    h2 = jnp.maximum(h1 @ w2 + b2, 0.0)
    return h2 @ w3 + b3


if __name__ == "__main__":
    # x1, x2: (batch=2, channels=4, 16, 16) -> flattened D_in = 1024
    B, C, H, W = 2, 4, 16, 16
    D_IN = C * H * W
    HIDDEN, D_OUT = 128, 32

    key = jax.random.PRNGKey(0)
    kp, k1, k2 = jax.random.split(key, 3)
    raw_params = init_params(kp, D_IN, HIDDEN, D_OUT)
    prepared = prepare_params(raw_params)   # one-time packing, outside the forward path

    x1 = jax.random.normal(k1, (B, C, H, W), jnp.float32)
    x2 = jax.random.normal(k2, (B, C, H, W), jnp.float32)

    fwd = jax.jit(lambda a, b: double_net_forward(a, b, prepared))
    out1, out2 = fwd(x1, x2)
    jax.block_until_ready((out1, out2))

    assert out1.shape == (B, D_OUT) and out2.shape == (B, D_OUT)

    # Tight check against a bf16-precision JAX reference (same numerics as kernel).
    ref1_bf = _reference_bf16(x1.reshape(B, -1), raw_params)
    ref2_bf = _reference_bf16(x2.reshape(B, -1), raw_params)
    assert jnp.allclose(out1, ref1_bf, atol=2e-3, rtol=2e-3)
    assert jnp.allclose(out2, ref2_bf, atol=2e-3, rtol=2e-3)

    # Loose sanity check against the full-f32 reference.
    ref1_f32 = _reference_f32(x1.reshape(B, -1), raw_params)
    ref2_f32 = _reference_f32(x2.reshape(B, -1), raw_params)
    assert jnp.allclose(out1, ref1_f32, atol=5e-2, rtol=5e-2)
    assert jnp.allclose(out2, ref2_f32, atol=5e-2, rtol=5e-2)

    # Single-branch path (DoubleNet.get_embedding).
    emb = get_embedding(x1, prepared)
    jax.block_until_ready(emb)
    assert emb.shape == (B, D_OUT)
    assert jnp.allclose(emb, out1, atol=2e-3, rtol=2e-3)

    print("KERNEL_OK")
</pallas_src>

<mosaic_0001>
module attributes {stable_mosaic.version = 11 : i64} {
  func.func @_mlp_kernel(%arg0: i32, %arg1: memref<16x1024xf32, #tpu.memory_space<vmem>>, %arg2: memref<16x1024xf32, #tpu.memory_space<vmem>>, %arg3: memref<1024x128xbf16, #tpu.memory_space<vmem>>, %arg4: memref<1x128xf32, #tpu.memory_space<vmem>>, %arg5: memref<128x128xbf16, #tpu.memory_space<vmem>>, %arg6: memref<1x128xf32, #tpu.memory_space<vmem>>, %arg7: memref<128x128xbf16, #tpu.memory_space<vmem>>, %arg8: memref<1x128xf32, #tpu.memory_space<vmem>>, %arg9: memref<16x128xf32, #tpu.memory_space<vmem>>, %arg10: memref<16x128xf32, #tpu.memory_space<vmem>>) attributes {dimension_semantics = [#tpu.dimension_semantics<parallel>], iteration_bounds = array<i64: 1>, scalar_prefetch = 0 : i64, scratch_operands = 0 : i64, tpu.core_type = #tpu.core_type<tc>, window_params = [{transform_indices = @transform_0, window_bounds = array<i64: 16, 1024>}, {transform_indices = @transform_1, window_bounds = array<i64: 16, 1024>}, {pipeline_mode = #tpu.pipeline_mode<synchronous>, transform_indices = @transform_2, window_bounds = array<i64: 1024, 128>}, {pipeline_mode = #tpu.pipeline_mode<synchronous>, transform_indices = @transform_3, window_bounds = array<i64: 1, 128>}, {pipeline_mode = #tpu.pipeline_mode<synchronous>, transform_indices = @transform_4, window_bounds = array<i64: 128, 128>}, {pipeline_mode = #tpu.pipeline_mode<synchronous>, transform_indices = @transform_5, window_bounds = array<i64: 1, 128>}, {pipeline_mode = #tpu.pipeline_mode<synchronous>, transform_indices = @transform_6, window_bounds = array<i64: 128, 128>}, {pipeline_mode = #tpu.pipeline_mode<synchronous>, transform_indices = @transform_7, window_bounds = array<i64: 1, 128>}, {transform_indices = @transform_8, window_bounds = array<i64: 16, 128>}, {transform_indices = @transform_9, window_bounds = array<i64: 16, 128>}]} {
    %c0 = arith.constant 0 : index
    %c0_0 = arith.constant 0 : index
    %0 = vector.load %arg1[%c0, %c0_0] : memref<16x1024xf32, #tpu.memory_space<vmem>>, vector<16x1024xf32>
    %c0_1 = arith.constant 0 : index
    %c0_2 = arith.constant 0 : index
    %1 = vector.load %arg2[%c0_1, %c0_2] : memref<16x1024xf32, #tpu.memory_space<vmem>>, vector<16x1024xf32>
    %2 = tpu.concatenate %0, %1 in 0 : vector<16x1024xf32>, vector<16x1024xf32> -> vector<32x1024xf32>
    %3 = arith.truncf %2 : vector<32x1024xf32> to vector<32x1024xbf16>
    %c0_3 = arith.constant 0 : index
    %c0_4 = arith.constant 0 : index
    %4 = vector.load %arg3[%c0_3, %c0_4] : memref<1024x128xbf16, #tpu.memory_space<vmem>>, vector<1024x128xbf16>
    %cst = arith.constant dense<0.000000e+00> : vector<32x128xf32>
    %5 = tpu.matmul %3, %4, %cst {dimension_numbers = #tpu.dot_dimension_numbers<[1], [0], [0], [1], [0, 0, 1, 1], [], []>} : vector<32x1024xbf16>, vector<1024x128xbf16>, vector<32x128xf32> -> vector<32x128xf32>
    %c0_5 = arith.constant 0 : index
    %c0_6 = arith.constant 0 : index
    %6 = vector.load %arg4[%c0_5, %c0_6] : memref<1x128xf32, #tpu.memory_space<vmem>>, vector<1x128xf32>
    %7 = vector.broadcast %6 : vector<1x128xf32> to vector<32x128xf32>
    %8 = arith.addf %5, %7 : vector<32x128xf32>
    %cst_7 = arith.constant 0.000000e+00 : f32
    %9 = vector.broadcast %cst_7 : f32 to vector<32x128xf32>
    %10 = arith.maximumf %8, %9 : vector<32x128xf32>
    %11 = arith.truncf %10 : vector<32x128xf32> to vector<32x128xbf16>
    %c0_8 = arith.constant 0 : index
    %c0_9 = arith.constant 0 : index
    %12 = vector.load %arg5[%c0_8, %c0_9] : memref<128x128xbf16, #tpu.memory_space<vmem>>, vector<128x128xbf16>
    %cst_10 = arith.constant dense<0.000000e+00> : vector<32x128xf32>
    %13 = tpu.matmul %11, %12, %cst_10 {dimension_numbers = #tpu.dot_dimension_numbers<[1], [0], [0], [1], [0, 0, 1, 1], [], []>} : vector<32x128xbf16>, vector<128x128xbf16>, vector<32x128xf32> -> vector<32x128xf32>
    %c0_11 = arith.constant 0 : index
    %c0_12 = arith.constant 0 : index
    %14 = vector.load %arg6[%c0_11, %c0_12] : memref<1x128xf32, #tpu.memory_space<vmem>>, vector<1x128xf32>
    %15 = vector.broadcast %14 : vector<1x128xf32> to vector<32x128xf32>
    %16 = arith.addf %13, %15 : vector<32x128xf32>
    %cst_13 = arith.constant 0.000000e+00 : f32
    %17 = vector.broadcast %cst_13 : f32 to vector<32x128xf32>
    %18 = arith.maximumf %16, %17 : vector<32x128xf32>
    %19 = arith.truncf %18 : vector<32x128xf32> to vector<32x128xbf16>
    %c0_14 = arith.constant 0 : index
    %c0_15 = arith.constant 0 : index
    %20 = vector.load %arg7[%c0_14, %c0_15] : memref<128x128xbf16, #tpu.memory_space<vmem>>, vector<128x128xbf16>
    %cst_16 = arith.constant dense<0.000000e+00> : vector<32x128xf32>
    %21 = tpu.matmul %19, %20, %cst_16 {dimension_numbers = #tpu.dot_dimension_numbers<[1], [0], [0], [1], [0, 0, 1, 1], [], []>} : vector<32x128xbf16>, vector<128x128xbf16>, vector<32x128xf32> -> vector<32x128xf32>
    %c0_17 = arith.constant 0 : index
    %c0_18 = arith.constant 0 : index
    %22 = vector.load %arg8[%c0_17, %c0_18] : memref<1x128xf32, #tpu.memory_space<vmem>>, vector<1x128xf32>
    %23 = vector.broadcast %22 : vector<1x128xf32> to vector<32x128xf32>
    %24 = arith.addf %21, %23 : vector<32x128xf32>
    %25 = vector.extract_strided_slice %24 {offsets = [0, 0], sizes = [16, 128], strides = [1, 1]} : vector<32x128xf32> to vector<16x128xf32>
    %c0_19 = arith.constant 0 : index
    %c0_20 = arith.constant 0 : index
    %26 = vector.load %arg9[%c0_19, %c0_20] : memref<16x128xf32, #tpu.memory_space<vmem>>, vector<16x128xf32>
    tpu.vector_store %arg9[%c0_19, %c0_20], %25 {strides = array<i32>} : memref<16x128xf32, #tpu.memory_space<vmem>>, vector<16x128xf32>,
    %27 = vector.extract_strided_slice %24 {offsets = [16, 0], sizes = [16, 128], strides = [1, 1]} : vector<32x128xf32> to vector<16x128xf32>
    %c0_21 = arith.constant 0 : index
    %c0_22 = arith.constant 0 : index
    %28 = vector.load %arg10[%c0_21, %c0_22] : memref<16x128xf32, #tpu.memory_space<vmem>>, vector<16x128xf32>
    tpu.vector_store %arg10[%c0_21, %c0_22], %27 {strides = array<i32>} : memref<16x128xf32, #tpu.memory_space<vmem>>, vector<16x128xf32>,
    return
  }
  func.func @transform_0(%arg0: i32) -> (i32, i32) {
    %c0_i32 = arith.constant 0 : i32
    %c0_i32_0 = arith.constant 0 : i32
    return %arg0, %c0_i32 : i32, i32
  }
  func.func @transform_1(%arg0: i32) -> (i32, i32) {
    %c0_i32 = arith.constant 0 : i32
    %c0_i32_0 = arith.constant 0 : i32
    return %arg0, %c0_i32 : i32, i32
  }
  func.func @transform_2(%arg0: i32) -> (i32, i32) {
    %c0_i32 = arith.constant 0 : i32
    %c0_i32_0 = arith.constant 0 : i32
    %c0_i32_1 = arith.constant 0 : i32
    return %c0_i32, %c0_i32_0 : i32, i32
  }
  func.func @transform_3(%arg0: i32) -> (i32, i32) {
    %c0_i32 = arith.constant 0 : i32
    %c0_i32_0 = arith.constant 0 : i32
    %c0_i32_1 = arith.constant 0 : i32
    return %c0_i32, %c0_i32_0 : i32, i32
  }
  func.func @transform_4(%arg0: i32) -> (i32, i32) {
    %c0_i32 = arith.constant 0 : i32
    %c0_i32_0 = arith.constant 0 : i32
    %c0_i32_1 = arith.constant 0 : i32
    return %c0_i32, %c0_i32_0 : i32, i32
  }
  func.func @transform_5(%arg0: i32) -> (i32, i32) {
    %c0_i32 = arith.constant 0 : i32
    %c0_i32_0 = arith.constant 0 : i32
    %c0_i32_1 = arith.constant 0 : i32
    return %c0_i32, %c0_i32_0 : i32, i32
  }
  func.func @transform_6(%arg0: i32) -> (i32, i32) {
    %c0_i32 = arith.constant 0 : i32
    %c0_i32_0 = arith.constant 0 : i32
    %c0_i32_1 = arith.constant 0 : i32
    return %c0_i32, %c0_i32_0 : i32, i32
  }
  func.func @transform_7(%arg0: i32) -> (i32, i32) {
    %c0_i32 = arith.constant 0 : i32
    %c0_i32_0 = arith.constant 0 : i32
    %c0_i32_1 = arith.constant 0 : i32
    return %c0_i32, %c0_i32_0 : i32, i32
  }
  func.func @transform_8(%arg0: i32) -> (i32, i32) {
    %c0_i32 = arith.constant 0 : i32
    %c0_i32_0 = arith.constant 0 : i32
    return %arg0, %c0_i32 : i32, i32
  }
  func.func @transform_9(%arg0: i32) -> (i32, i32) {
    %c0_i32 = arith.constant 0 : i32
    %c0_i32_0 = arith.constant 0 : i32
    return %arg0, %c0_i32 : i32, i32
  }
}

</mosaic_0001>

<bundles_post_ra>
// kernel: _lambda_.1
= control target key start
LH: loop header
LB: loop body
LE: loop exit
PB: predicated region body
PF: predicated region fallthrough
CT: control target
= control target key end

     0   :  { %15 = vsyncpa [#allocation3], 0  ;;  %s1410_s12 = smov [#allocation2]   ;;  %s1411_s14 = smov 64   ;;  %s1799_s0 = inlined_call_operand.vmem [shape: f32[16,1024], index: 0, kind: input, shape index: {}]   ;;  %s1800_s1 = inlined_call_operand.vmem [shape: f32[16,1024], index: 1, kind: input, shape index: {}]   ;;  %s1801_s2 = inlined_call_operand.vmem [shape: bf16[1024,128], index: 2, kind: input, shape index: {}]   ;;  %s1802_s3 = inlined_call_operand.vmem [shape: f32[1,128], index: 3, kind: input, shape index: {}]   ;;  %s1803_s4 = inlined_call_operand.hbm [shape: bf16[128,128], index: 4, kind: input, shape index: {}]   ;;  %s1804_s5 = inlined_call_operand.vmem [shape: f32[1,128], index: 5, kind: input, shape index: {}]   ;;  %s1805_s6 = inlined_call_operand.vmem [shape: bf16[128,128], index: 6, kind: input, shape index: {}]   ;;  %s1806_s7 = inlined_call_operand.vmem [shape: f32[1,128], index: 7, kind: input, shape index: {}]   ;;  %s1807_s8 = inlined_call_operand.vmem [shape: f32[16,128], index: 8, kind: output, shape index: {0}]   ;;  %s1808_s9 = inlined_call_operand.vmem [shape: f32[16,128], index: 9, kind: output, shape index: {1}]  }
   0x1   :  { %s28_s11 = sshll.u32 %s1803_s4, 4  ;;  %s30_s13 = sshll.u32 %s1410_s12, 4  ;;  %s29_s11 = int_to_ptr.hbm [resolvable:$true] %s28_s11  ;;  %s31_s13 = int_to_ptr.vmem [resolvable:$true] %s30_s13 }
   0x2   :  { %s1412_s15 = smov 4  }
   0x3   :  { %36 = dma.hbm_to_vmem [thread:$0]  %s29_s11, 1024, %s31_s13, [#allocation3], %s1411_s14, %s1411_s14, %s1412_s15  }
   0x4   :  { %1408 = dma.done.wait [#allocation3], 1024  }
   0x5   :  { %1409 = vsyncadd [#allocation3], 4294966272  ;;  %v1289_v0 = vld [vmem:[%s1801_s2 + $0x38] sm:$0xff]  ;;  %v1288_v4 = vld [vmem:[%s1801_s2 + $0x30] sm:$0xff] }
   0x6   :  { %v1297_v1 = vld [vmem:[%s1801_s2 + $0x78] sm:$0xff]  ;;  %611 = vmatpush.bf16.msra.mxu0 %v1289_v0  ;;  %v1296_v5 = vld [vmem:[%s1801_s2 + $0x70] sm:$0xff]  ;;  %v1287_v8 = vld [vmem:[%s1801_s2 + $0x28] sm:$0xff] }
   0x7   :  { %v1305_v2 = vld [vmem:[%s1801_s2 + $0xb8] sm:$0xff]  ;;  %630 = vmatpush.bf16.msra.mxu1 %v1297_v1  ;;  %v1304_v6 = vld [vmem:[%s1801_s2 + $0xb0] sm:$0xff]  ;;  %v1295_v9 = vld [vmem:[%s1801_s2 + $0x68] sm:$0xff] }
   0x8   :  { %v1313_v3 = vld [vmem:[%s1801_s2 + $0xf8] sm:$0xff]  ;;  %649 = vmatpush.bf16.msra.mxu2 %v1305_v2  ;;  %v1312_v7 = vld [vmem:[%s1801_s2 + $0xf0] sm:$0xff]  ;;  %v1303_v10 = vld [vmem:[%s1801_s2 + $0xa8] sm:$0xff] }
   0x9   :  { %668 = vmatpush.bf16.msra.mxu3 %v1313_v3  ;;  %v1311_v11 = vld [vmem:[%s1801_s2 + $0xe8] sm:$0xff]  ;;  %v1286_v12 = vld [vmem:[%s1801_s2 + $0x20] sm:$0xff]  ;;  %v1285_v16 = vld [vmem:[%s1801_s2 + $0x18] sm:$0xff] }
   0xa   :  { %612 = vmatpush.bf16.msra.mxu0 %v1288_v4  ;;  %v1294_v13 = vld [vmem:[%s1801_s2 + $0x60] sm:$0xff]  ;;  %v1293_v17 = vld [vmem:[%s1801_s2 + $0x58] sm:$0xff]  ;;  %v1284_v20 = vld [vmem:[%s1801_s2 + $0x10] sm:$0xff] }
   0xb   :  { %631 = vmatpush.bf16.msra.mxu1 %v1296_v5  ;;  %v1302_v14 = vld [vmem:[%s1801_s2 + $0xa0] sm:$0xff]  ;;  %v1301_v18 = vld [vmem:[%s1801_s2 + $0x98] sm:$0xff]  ;;  %v1292_v21 = vld [vmem:[%s1801_s2 + $0x50] sm:$0xff] }
   0xc   :  { %650 = vmatpush.bf16.msra.mxu2 %v1304_v6  ;;  %v1310_v15 = vld [vmem:[%s1801_s2 + $0xe0] sm:$0xff]  ;;  %v1309_v19 = vld [vmem:[%s1801_s2 + $0xd8] sm:$0xff]  ;;  %v1300_v22 = vld [vmem:[%s1801_s2 + $0x90] sm:$0xff] }
   0xd   :  { %669 = vmatpush.bf16.msra.mxu3 %v1312_v7  ;;  %v1308_v23 = vld [vmem:[%s1801_s2 + $0xd0] sm:$0xff]  ;;  %v1283_v24 = vld [vmem:[%s1801_s2 + $0x8] sm:$0xff]  ;;  %v1282_v28 = vld [vmem:[%s1801_s2] sm:$0xff] }
   0xe   :  { %613 = vmatpush.bf16.msra.mxu0 %v1287_v8  ;;  %v1291_v25 = vld [vmem:[%s1801_s2 + $0x48] sm:$0xff]  ;;  %v1290_v29 = vld [vmem:[%s1801_s2 + $0x40] sm:$0xff]  ;;  %v49_v36 = vld [vmem:[%s1799_s0 + $0x10] sm:$0xff] }
   0xf   :  { %632 = vmatpush.bf16.msra.mxu1 %v1295_v9  ;;  %v1299_v26 = vld [vmem:[%s1801_s2 + $0x88] sm:$0xff]  ;;  %v47_v30 = vld [vmem:[%s1799_s0] sm:$0xff]  ;;  %v57_v37 = vld [vmem:[%s1799_s0 + $0x50] sm:$0xff] }
  0x10   :  { %651 = vmatpush.bf16.msra.mxu2 %v1303_v10  ;;  %v1307_v27 = vld [vmem:[%s1801_s2 + $0xc8] sm:$0xff]  ;;  %v55_v31 = vld [vmem:[%s1799_s0 + $0x40] sm:$0xff]  ;;  %v50_v38 = vld [vmem:[%s1799_s0 + $0x18] sm:$0xff]  ;;  %v81_v44 = vpack.c.bf16 %v57_v37, %v49_v36 }
  0x11   :  { %670 = vmatpush.bf16.msra.mxu3 %v1311_v11  ;;  %v1298_v32 = vld [vmem:[%s1801_s2 + $0x80] sm:$0xff]  ;;  %v48_v34 = vld [vmem:[%s1799_s0 + $0x8] sm:$0xff]  ;;  %v58_v39 = vld [vmem:[%s1799_s0 + $0x58] sm:$0xff]  ;;  %v79_v42 = vpack.c.bf16 %v55_v31, %v47_v30 }
  0x12   :  { %614 = vmatpush.bf16.msra.mxu0 %v1286_v12  ;;  %v1306_v33 = vld [vmem:[%s1801_s2 + $0xc0] sm:$0xff]  ;;  %v56_v35 = vld [vmem:[%s1799_s0 + $0x48] sm:$0xff]  ;;  %v1337_v40 = vld [vmem:[%s1801_s2 + $0x1b8] sm:$0xff]  ;;  %v82_v45 = vpack.c.bf16 %v58_v39, %v50_v38 }
  0x13   :  { %633 = vmatpush.bf16.msra.mxu1 %v1294_v13  ;;  %v1321_v41 = vld [vmem:[%s1801_s2 + $0x138] sm:$0xff]  ;;  %v80_v43 = vpack.c.bf16 %v56_v35, %v48_v34  ;;  %v1336_v48 = vld [vmem:[%s1801_s2 + $0x1b0] sm:$0xff]  ;;  %v1335_v52 = vld [vmem:[%s1801_s2 + $0x1a8] sm:$0xff] }
  0x14   :  { %652 = vmatpush.bf16.msra.mxu2 %v1302_v14  ;;  %v1329_v46 = vld [vmem:[%s1801_s2 + $0x178] sm:$0xff]  ;;  %v1320_v49 = vld [vmem:[%s1801_s2 + $0x130] sm:$0xff]  ;;  %v1319_v53 = vld [vmem:[%s1801_s2 + $0x128] sm:$0xff] }
  0x15   :  { %671 = vmatpush.bf16.msra.mxu3 %v1310_v15  ;;  %v1345_v47 = vld [vmem:[%s1801_s2 + $0x1f8] sm:$0xff]  ;;  %v1328_v50 = vld [vmem:[%s1801_s2 + $0x170] sm:$0xff]  ;;  %v1327_v54 = vld [vmem:[%s1801_s2 + $0x168] sm:$0xff] }
  0x16   :  { %615 = vmatpush.bf16.msra.mxu0 %v1285_v16  ;;  %v1344_v51 = vld [vmem:[%s1801_s2 + $0x1f0] sm:$0xff]  ;;  %v1343_v55 = vld [vmem:[%s1801_s2 + $0x1e8] sm:$0xff]  ;;  %v1334_v56 = vld [vmem:[%s1801_s2 + $0x1a0] sm:$0xff] }
  0x17   :  { %634 = vmatpush.bf16.msra.mxu1 %v1293_v17  ;;  %v1318_v57 = vld [vmem:[%s1801_s2 + $0x120] sm:$0xff]  ;;  %v64_v62 = vld [vmem:[%s1800_s1 + $0x8] sm:$0xff]  ;;  %v65_v0 = vld [vmem:[%s1800_s1 + $0x10] sm:$0xff] }
  0x18   :  { %653 = vmatpush.bf16.msra.mxu2 %v1301_v18  ;;  %v1326_v58 = vld [vmem:[%s1801_s2 + $0x160] sm:$0xff]  ;;  %v72_v63 = vld [vmem:[%s1800_s1 + $0x48] sm:$0xff]  ;;  %v73_v1 = vld [vmem:[%s1800_s1 + $0x50] sm:$0xff] }
  0x19   :  { %672 = vmatpush.bf16.msra.mxu3 %v1309_v19  ;;  %v1342_v59 = vld [vmem:[%s1801_s2 + $0x1e0] sm:$0xff]  ;;  %v66_v2 = vld [vmem:[%s1800_s1 + $0x18] sm:$0xff]  ;;  %v88_v7 = vpack.c.bf16 %v72_v63, %v64_v62  ;;  %v89_v8 = vpack.c.bf16 %v73_v1, %v65_v0  ;;  %v1332_v12 = vld [vmem:[%s1801_s2 + $0x190] sm:$0xff] }
  0x1a   :  { %616 = vmatpush.bf16.msra.mxu0 %v1284_v20  ;;  %v63_v60 = vld [vmem:[%s1800_s1] sm:$0xff]  ;;  %v74_v3 = vld [vmem:[%s1800_s1 + $0x58] sm:$0xff]  ;;  %v1316_v13 = vld [vmem:[%s1801_s2 + $0x110] sm:$0xff] }
  0x1b   :  { %635 = vmatpush.bf16.msra.mxu1 %v1292_v21  ;;  %v71_v61 = vld [vmem:[%s1800_s1 + $0x40] sm:$0xff]  ;;  %v1333_v4 = vld [vmem:[%s1801_s2 + $0x198] sm:$0xff]  ;;  %v90_v9 = vpack.c.bf16 %v74_v3, %v66_v2  ;;  %v1324_v14 = vld [vmem:[%s1801_s2 + $0x150] sm:$0xff] }
  0x1c   :  { %654 = vmatpush.bf16.msra.mxu2 %v1300_v22  ;;  %v1317_v5 = vld [vmem:[%s1801_s2 + $0x118] sm:$0xff]  ;;  %v87_v6 = vpack.c.bf16 %v71_v61, %v63_v60  ;;  %v1340_v15 = vld [vmem:[%s1801_s2 + $0x1d0] sm:$0xff]  ;;  %v1331_v16 = vld [vmem:[%s1801_s2 + $0x188] sm:$0xff] }
  0x1d   :  { %673 = vmatpush.bf16.msra.mxu3 %v1308_v23  ;;  %v1325_v10 = vld [vmem:[%s1801_s2 + $0x158] sm:$0xff]  ;;  %v1315_v17 = vld [vmem:[%s1801_s2 + $0x108] sm:$0xff]  ;;  %v1330_v20 = vld [vmem:[%s1801_s2 + $0x180] sm:$0xff] }
  0x1e   :  { %617 = vmatpush.bf16.msra.mxu0 %v1283_v24  ;;  %v1341_v11 = vld [vmem:[%s1801_s2 + $0x1d8] sm:$0xff]  ;;  %v1323_v18 = vld [vmem:[%s1801_s2 + $0x148] sm:$0xff]  ;;  %v1314_v21 = vld [vmem:[%s1801_s2 + $0x100] sm:$0xff] }
  0x1f   :  { %636 = vmatpush.bf16.msra.mxu1 %v1291_v25  ;;  %v1339_v19 = vld [vmem:[%s1801_s2 + $0x1c8] sm:$0xff]  ;;  %v1322_v22 = vld [vmem:[%s1801_s2 + $0x140] sm:$0xff]  ;;  %v54_v30 = vld [vmem:[%s1799_s0 + $0x38] sm:$0xff] }
  0x20   :  { %655 = vmatpush.bf16.msra.mxu2 %v1299_v26  ;;  %v1338_v23 = vld [vmem:[%s1801_s2 + $0x1c0] sm:$0xff]  ;;  %v52_v26 = vld [vmem:[%s1799_s0 + $0x28] sm:$0xff]  ;;  %v62_v31 = vld [vmem:[%s1799_s0 + $0x78] sm:$0xff] }
  0x21   :  { %674 = vmatpush.bf16.msra.mxu3 %v1307_v27  ;;  %v51_v24 = vld [vmem:[%s1799_s0 + $0x20] sm:$0xff]  ;;  %v60_v27 = vld [vmem:[%s1799_s0 + $0x68] sm:$0xff]  ;;  %v86_v35 = vpack.c.bf16 %v62_v31, %v54_v30 }
  0x22   :  { %618 = vmatpush.bf16.msra.mxu0 %v1282_v28  ;;  %v59_v25 = vld [vmem:[%s1799_s0 + $0x60] sm:$0xff]  ;;  %v53_v28 = vld [vmem:[%s1799_s0 + $0x30] sm:$0xff]  ;;  %v68_v38 = vld [vmem:[%s1800_s1 + $0x28] sm:$0xff] }
  0x23   :  { %637 = vmatpush.bf16.msra.mxu1 %v1290_v29  ;;  %v61_v29 = vld [vmem:[%s1799_s0 + $0x70] sm:$0xff]  ;;  %v67_v36 = vld [vmem:[%s1800_s1 + $0x20] sm:$0xff]  ;;  %v76_v39 = vld [vmem:[%s1800_s1 + $0x68] sm:$0xff] }
  0x24   :  { %656 = vmatpush.bf16.msra.mxu2 %v1298_v32  ;;  %v83_v32 = vpack.c.bf16 %v59_v25, %v51_v24  ;;  %v85_v34 = vpack.c.bf16 %v61_v29, %v53_v28  ;;  %v75_v37 = vld [vmem:[%s1800_s1 + $0x60] sm:$0xff]  ;;  %v1347_v0 = vld [vmem:[#allocation2 + $0x8] sm:$0xff]  ;;  %v1361_v24 = vld [vmem:[%s1805_s6 + $0x38] sm:$0xff] }
  0x25   :  { %675 = vmatpush.bf16.msra.mxu3 %v1306_v33  ;;  %619 = vmatmul.bf16.vlgmr.msra.gmra.mxu0 %v79_v42  ;;  %v84_v33 = vpack.c.bf16 %v60_v27, %v52_v26  ;;  %v70_v42 = vld [vmem:[%s1800_s1 + $0x38] sm:$0xff]  ;;  %v1381_v1 = vld [vmem:[%s1802_s3] ss:$0 sm:$0xff]  ;;  %v1360_v28 = vld [vmem:[%s1805_s6 + $0x30] sm:$0xff] }
  0x26   :  { %687 = vmatpush.bf16.msrb.mxu0 %v1321_v41  ;;  %638 = vmatmul.bf16.vlgmr.msra.gmra.mxu1 %v80_v43  ;;  %v77_v41 = vld [vmem:[%s1800_s1 + $0x70] sm:$0xff]  ;;  %v78_v43 = vld [vmem:[%s1800_s1 + $0x78] sm:$0xff]  ;;  %v1346_v2 = vld [vmem:[#allocation2] sm:$0xff] }
  0x27   :  { %657 = vmatmul.bf16.vlgmr.msra.gmra.mxu2 %v81_v44  ;;  %706 = vmatpush.bf16.msrb.mxu1 %v1329_v46  ;;  %v91_v44 = vpack.c.bf16 %v75_v37, %v67_v36 }
  0x28   :  { %725 = vmatpush.bf16.msrb.mxu2 %v1337_v40  ;;  %676 = vmatmul.bf16.vlgmr.msra.gmra.mxu3 %v82_v45  ;;  %v69_v40 = vld [vmem:[%s1800_s1 + $0x30] sm:$0xff]  ;;  %v92_v45 = vpack.c.bf16 %v76_v39, %v68_v38 }
  0x29   :  { %744 = vmatpush.bf16.msrb.mxu3 %v1345_v47  ;;  %v93_v46 = vpack.c.bf16 %v77_v41, %v69_v40  ;;  %v94_v47 = vpack.c.bf16 %v78_v43, %v70_v42  ;;  %v1358_v42 = vld [vmem:[%s1805_s6 + $0x20] sm:$0xff] }
  0x2a   :  { %688 = vmatpush.bf16.msrb.mxu0 %v1320_v49  ;;  %v1352_v49 = vld [vmem:[#allocation2 + $0x30] sm:$0xff] }
  0x2b   :  { %707 = vmatpush.bf16.msrb.mxu1 %v1328_v50 }
  0x2c   :  { %726 = vmatpush.bf16.msrb.mxu2 %v1336_v48  ;;  %v1353_v48 = vld [vmem:[#allocation2 + $0x38] sm:$0xff] }
  0x2d   :  { %745 = vmatpush.bf16.msrb.mxu3 %v1344_v51 }
  0x2e   :  { %689 = vmatpush.bf16.msrb.mxu0 %v1319_v53  ;;  %v1350_v53 = vld [vmem:[#allocation2 + $0x20] sm:$0xff] }
  0x2f   :  { %708 = vmatpush.bf16.msrb.mxu1 %v1327_v54 }
  0x30   :  { %727 = vmatpush.bf16.msrb.mxu2 %v1335_v52  ;;  %v1351_v52 = vld [vmem:[#allocation2 + $0x28] sm:$0xff] }
  0x31   :  { %746 = vmatpush.bf16.msrb.mxu3 %v1343_v55 }
  0x32   :  { %690 = vmatpush.bf16.msrb.mxu0 %v1318_v57 }
  0x33   :  { %709 = vmatpush.bf16.msrb.mxu1 %v1326_v58  ;;  %v1349_v58 = vld [vmem:[#allocation2 + $0x18] sm:$0xff] }
  0x34   :  { %728 = vmatpush.bf16.msrb.mxu2 %v1334_v56 }
  0x35   :  { %747 = vmatpush.bf16.msrb.mxu3 %v1342_v59  ;;  %624 = vmatmul.bf16.gmra.mxu0 %v87_v6  ;;  %v1348_v59 = vld [vmem:[#allocation2 + $0x10] sm:$0xff] }
  0x36   :  { %691 = vmatpush.bf16.msrb.mxu0 %v1317_v5  ;;  %643 = vmatmul.bf16.gmra.mxu1 %v88_v7 }
  0x37   :  { %662 = vmatmul.bf16.gmra.mxu2 %v89_v8  ;;  %710 = vmatpush.bf16.msrb.mxu1 %v1325_v10 }
  0x38   :  { %729 = vmatpush.bf16.msrb.mxu2 %v1333_v4  ;;  %681 = vmatmul.bf16.gmra.mxu3 %v90_v9 }
  0x39   :  { %748 = vmatpush.bf16.msrb.mxu3 %v1341_v11 }
  0x3a   :  { %692 = vmatpush.bf16.msrb.mxu0 %v1316_v13 }
  0x3b   :  { %711 = vmatpush.bf16.msrb.mxu1 %v1324_v14 }
  0x3c   :  { %730 = vmatpush.bf16.msrb.mxu2 %v1332_v12 }
  0x3d   :  { %749 = vmatpush.bf16.msrb.mxu3 %v1340_v15 }
  0x3e   :  { %693 = vmatpush.bf16.msrb.mxu0 %v1315_v17 }
  0x3f   :  { %712 = vmatpush.bf16.msrb.mxu1 %v1323_v18 }
  0x40   :  { %731 = vmatpush.bf16.msrb.mxu2 %v1331_v16 }
  0x41   :  { %750 = vmatpush.bf16.msrb.mxu3 %v1339_v19 }
  0x42   :  { %694 = vmatpush.bf16.msrb.mxu0 %v1314_v21 }
  0x43   :  { %713 = vmatpush.bf16.msrb.mxu1 %v1322_v22 }
  0x44   :  { %732 = vmatpush.bf16.msrb.mxu2 %v1330_v20 }
  0x45   :  { %751 = vmatpush.bf16.msrb.mxu3 %v1338_v23  ;;  %695 = vmatmul.bf16.vlgmr.msrb.gmra.mxu0 %v83_v32 }
  0x46   :  { %714 = vmatmul.bf16.vlgmr.msrb.gmra.mxu1 %v84_v33  ;;  %837 = vmatpush.bf16.msra.mxu0 %v1353_v48  ;;  %v1359_v33 = vld [vmem:[%s1805_s6 + $0x28] sm:$0xff] }
  0x47   :  { %733 = vmatmul.bf16.vlgmr.msrb.gmra.mxu2 %v85_v34  ;;  %930 = vmatpush.bf16.msra.mxu1 %v1361_v24 }
  0x48   :  { %752 = vmatmul.bf16.vlgmr.msrb.gmra.mxu3 %v86_v35  ;;  %1362 = vmatpush.bf16.msra.mxu2 %v1353_v48 }
  0x49   :  { %1370 = vmatpush.bf16.msra.mxu3 %v1361_v24 }
  0x4a   :  { %838 = vmatpush.bf16.msra.mxu0 %v1352_v49 }
  0x4b   :  { %931 = vmatpush.bf16.msra.mxu1 %v1360_v28 }
  0x4c   :  { %1363 = vmatpush.bf16.msra.mxu2 %v1352_v49 }
  0x4d   :  { %1371 = vmatpush.bf16.msra.mxu3 %v1360_v28 }
  0x4e   :  { %839 = vmatpush.bf16.msra.mxu0 %v1351_v52 }
  0x4f   :  { %932 = vmatpush.bf16.msra.mxu1 %v1359_v33 }
  0x50   :  { %1364 = vmatpush.bf16.msra.mxu2 %v1351_v52 }
  0x51   :  { %1372 = vmatpush.bf16.msra.mxu3 %v1359_v33 }
  0x52   :  { %840 = vmatpush.bf16.msra.mxu0 %v1350_v53 }
  0x53   :  { %933 = vmatpush.bf16.msra.mxu1 %v1358_v42 }
  0x54   :  { %1365 = vmatpush.bf16.msra.mxu2 %v1350_v53 }
  0x55   :  { %700 = vmatmul.bf16.gmra.mxu0 %v91_v44  ;;  %1373 = vmatpush.bf16.msra.mxu3 %v1358_v42 }
  0x56   :  { %719 = vmatmul.bf16.gmra.mxu1 %v92_v45  ;;  %841 = vmatpush.bf16.msra.mxu0 %v1349_v58 }
  0x57   :  { %738 = vmatmul.bf16.gmra.mxu2 %v93_v46 }
  0x58   :  { %757 = vmatmul.bf16.gmra.mxu3 %v94_v47  ;;  %1366 = vmatpush.bf16.msra.mxu2 %v1349_v58 }
  0x5a   :  { %842 = vmatpush.bf16.msra.mxu0 %v1348_v59 }
  0x5c   :  { %1367 = vmatpush.bf16.msra.mxu2 %v1348_v59 }
  0x5e   :  { %843 = vmatpush.bf16.msra.mxu0 %v1347_v0 }
  0x60   :  { %1368 = vmatpush.bf16.msra.mxu2 %v1347_v0 }
  0x62   :  { %844 = vmatpush.bf16.msra.mxu0 %v1346_v2 }
  0x64   :  { %1369 = vmatpush.bf16.msra.mxu2 %v1346_v2 }
  0xa2   :  { %v620_v50 = vpop.f32.mrf.mxu0 }
  0xa3   :  { %v639_v51 = vpop.f32.mrf.mxu1  ;;  %v621_v5 = vadd.f32 %v1381_v1, %v620_v50 }
  0xa5   :  { %v640_v8 = vadd.f32 %v639_v51, %v621_v5  ;;  %v1355_v5 = vld [vmem:[%s1805_s6 + $0x8] sm:$0xff] }
  0xaa   :  { %v658_v54 = vpop.f32.mrf.mxu2  ;;  %v622_v56 = vpop.f32.mrf.mxu0 }
  0xab   :  { %v677_v55 = vpop.f32.mrf.mxu3  ;;  %v641_v57 = vpop.f32.mrf.mxu1  ;;  %v623_v9 = vadd.f32 %v1381_v1, %v622_v56  ;;  %v659_v12 = vadd.f32 %v658_v54, %v640_v8  ;;  %v1382_v8 = vld [vmem:[%s1804_s5] ss:$0 sm:$0xff] }
  0xad   :  { %v642_v15 = vadd.f32 %v641_v57, %v623_v9  ;;  %v678_v16 = vadd.f32 %v677_v55, %v659_v12 }
  0xb2   :  { %v660_v60 = vpop.f32.mrf.mxu2  ;;  %v625_v62 = vpop.f32.mrf.mxu0 }
  0xb3   :  { %v679_v61 = vpop.f32.mrf.mxu3  ;;  %v644_v63 = vpop.f32.mrf.mxu1  ;;  %v661_v17 = vadd.f32 %v660_v60, %v642_v15  ;;  %v626_v21 = vadd.f32 %v1381_v1, %v625_v62 }
  0xb5   :  { %v680_v20 = vadd.f32 %v679_v61, %v661_v17  ;;  %v645_v29 = vadd.f32 %v644_v63, %v626_v21 }
  0xba   :  { %v663_v3 = vpop.f32.mrf.mxu2  ;;  %v627_v6 = vpop.f32.mrf.mxu0 }
  0xbb   :  { %v682_v4 = vpop.f32.mrf.mxu3  ;;  %v646_v7 = vpop.f32.mrf.mxu1  ;;  %v628_v31 = vadd.f32 %v1381_v1, %v627_v6  ;;  %v664_v35 = vadd.f32 %v663_v3, %v645_v29  ;;  %v1357_v3 = vld [vmem:[%s1805_s6 + $0x18] sm:$0xff]  ;;  %v1354_v6 = vld [vmem:[%s1805_s6] sm:$0xff] }
  0xbc   :  { %934 = vmatpush.bf16.msra.mxu1 %v1357_v3  ;;  %1374 = vmatpush.bf16.msra.mxu3 %v1357_v3 }
  0xbd   :  { %v647_v40 = vadd.f32 %v646_v7, %v628_v31  ;;  %v683_v44 = vadd.f32 %v682_v4, %v664_v35  ;;  %v1356_v4 = vld [vmem:[%s1805_s6 + $0x10] sm:$0xff] }
  0xc0   :  { %935 = vmatpush.bf16.msra.mxu1 %v1356_v4  ;;  %1375 = vmatpush.bf16.msra.mxu3 %v1356_v4 }
  0xc2   :  { %v665_v10 = vpop.f32.mrf.mxu2  ;;  %v696_v13 = vpop.f32.mrf.mxu0 }
  0xc3   :  { %v684_v11 = vpop.f32.mrf.mxu3  ;;  %v715_v14 = vpop.f32.mrf.mxu1  ;;  %v697_v18 = vadd.f32 %v696_v13, %v678_v16  ;;  %v666_v45 = vadd.f32 %v665_v10, %v647_v40 }
  0xc4   :  { %936 = vmatpush.bf16.msra.mxu1 %v1355_v5  ;;  %1376 = vmatpush.bf16.msra.mxu3 %v1355_v5 }
  0xc5   :  { %v716_v26 = vadd.f32 %v715_v14, %v697_v18  ;;  %v685_v51 = vadd.f32 %v684_v11, %v666_v45 }
  0xc8   :  { %937 = vmatpush.bf16.msra.mxu1 %v1354_v6  ;;  %1377 = vmatpush.bf16.msra.mxu3 %v1354_v6 }
  0xca   :  { %v734_v19 = vpop.f32.mrf.mxu2  ;;  %v698_v23 = vpop.f32.mrf.mxu0 }
  0xcb   :  { %v753_v22 = vpop.f32.mrf.mxu3  ;;  %v717_v25 = vpop.f32.mrf.mxu1  ;;  %v699_v27 = vadd.f32 %v698_v23, %v680_v20  ;;  %v735_v30 = vadd.f32 %v734_v19, %v716_v26 }
  0xcd   :  { %v718_v32 = vadd.f32 %v717_v25, %v699_v27  ;;  %v754_v36 = vadd.f32 %v753_v22, %v735_v30  ;;  %v1383_v22 = vld [vmem:[%s1806_s7] ss:$0 sm:$0xff] }
  0xcf   :  { %v763_v46 = vmax.f32 %v754_v36, 0.0 }
  0xd2   :  { %v736_v34 = vpop.f32.mrf.mxu2  ;;  %v701_v39 = vpop.f32.mrf.mxu0 }
  0xd3   :  { %v737_v37 = vadd.f32 %v736_v34, %v718_v32  ;;  %v755_v38 = vpop.f32.mrf.mxu3  ;;  %v720_v43 = vpop.f32.mrf.mxu1  ;;  %v702_v49 = vadd.f32 %v701_v39, %v683_v44 }
  0xd5   :  { %v756_v41 = vadd.f32 %v755_v38, %v737_v37  ;;  %v721_v54 = vadd.f32 %v720_v43, %v702_v49 }
  0xd7   :  { %v764_v47 = vmax.f32 %v756_v41, 0.0 }
  0xd9   :  { %v767_v48 = vpack.c.bf16 %v764_v47, %v763_v46 }
  0xda   :  { %v739_v50 = vpop.f32.mrf.mxu2  ;;  %v703_v53 = vpop.f32.mrf.mxu0 }
  0xdb   :  { %v758_v52 = vpop.f32.mrf.mxu3  ;;  %845 = vmatmul.bf16.vlgmr.msra.gmra.mxu0 %v767_v48  ;;  %v704_v55 = vadd.f32 %v703_v53, %v685_v51  ;;  %v740_v56 = vadd.f32 %v739_v50, %v721_v54  ;;  %v722_v57 = vpop.f32.mrf.mxu1 }
  0xdd   :  { %v723_v58 = vadd.f32 %v722_v57, %v704_v55  ;;  %v759_v60 = vadd.f32 %v758_v52, %v740_v56 }
  0xdf   :  { %v765_v0 = vmax.f32 %v759_v60, 0.0 }
  0xe2   :  { %v741_v59 = vpop.f32.mrf.mxu2 }
  0xe3   :  { %v742_v61 = vadd.f32 %v741_v59, %v723_v58  ;;  %v760_v62 = vpop.f32.mrf.mxu3 }
  0xe5   :  { %v761_v63 = vadd.f32 %v760_v62, %v742_v61 }
  0xe7   :  { %v766_v1 = vmax.f32 %v761_v63, 0.0 }
  0xe9   :  { %v768_v2 = vpack.c.bf16 %v766_v1, %v765_v0 }
  0xeb   :  { %850 = vmatmul.bf16.vlgmr.msra.gmra.mxu2 %v768_v2 }
 0x158   :  { %v846_v7 = vpop.f32.mrf.mxu0 }
 0x159   :  { %v847_v9 = vadd.f32 %v1382_v8, %v846_v7 }
 0x15b   :  { %v856_v12 = vmax.f32 %v847_v9, 0.0 }
 0x160   :  { %v848_v10 = vpop.f32.mrf.mxu0 }
 0x161   :  { %v849_v11 = vadd.f32 %v1382_v8, %v848_v10 }
 0x163   :  { %v857_v13 = vmax.f32 %v849_v11, 0.0 }
 0x165   :  { %v860_v14 = vpack.c.bf16 %v857_v13, %v856_v12 }
 0x167   :  { %938 = vmatmul.bf16.vlgmr.msra.gmra.mxu1 %v860_v14 }
 0x16e   :  { %v851_v15 = vpop.f32.mrf.mxu2 }
 0x16f   :  { %v852_v16 = vadd.f32 %v1382_v8, %v851_v15 }
 0x171   :  { %v858_v19 = vmax.f32 %v852_v16, 0.0 }
 0x176   :  { %v853_v17 = vpop.f32.mrf.mxu2 }
 0x177   :  { %v854_v18 = vadd.f32 %v1382_v8, %v853_v17 }
 0x179   :  { %v859_v20 = vmax.f32 %v854_v18, 0.0 }
 0x17b   :  { %v861_v21 = vpack.c.bf16 %v859_v20, %v858_v19 }
 0x17d   :  { %943 = vmatmul.bf16.vlgmr.msra.gmra.mxu3 %v861_v21 }
 0x1e4   :  { %v939_v23 = vpop.f32.mrf.mxu1 }
 0x1e5   :  { %v940_v24 = vadd.f32 %v1383_v22, %v939_v23 }
 0x1e7   :  { %949 = vst [vmem:[%s1807_s8] sm:$0xff] %v940_v24 }
 0x1ec   :  { %v941_v25 = vpop.f32.mrf.mxu1 }
 0x1ed   :  { %v942_v26 = vadd.f32 %v1383_v22, %v941_v25 }
 0x1ef   :  { %950 = vst [vmem:[%s1807_s8 + $0x8] sm:$0xff] %v942_v26 }
 0x200   :  { %v944_v27 = vpop.f32.mrf.mxu3 }
 0x201   :  { %v945_v28 = vadd.f32 %v1383_v22, %v944_v27 }
 0x203   :  { %951 = vst [vmem:[%s1808_s9] sm:$0xff] %v945_v28 }
 0x208   :  { %v946_v29 = vpop.f32.mrf.mxu3 }
 0x209   :  { %v947_v30 = vadd.f32 %v1383_v22, %v946_v29 }
 0x20b   :  { %952 = vst [vmem:[%s1808_s9 + $0x8] sm:$0xff] %v947_v30 }
 0x20c   :  { %961 = vsyncpa [#allocation3], 1 }

</bundles_post_ra>
